<compile_context>
chip_gen: v6e
topology: v6e:2x2x1
jax: 0.10.0
libtpu: 0.0.40
codegen_flags: <defaults>
</compile_context>

<pallas_src>
import functools

import jax
import jax.numpy as jnp
from jax.experimental import pallas as pl
from jax.experimental.pallas import tpu as pltpu


def _round_up(x, m):
    return ((x + m - 1) // m) * m


def _mlp_kernel(x_ref, w12_ref, w3_ref, b_ref, o_ref):
    # Shapes (all static, from the block specs):
    #   x_ref:   (tile_b, in_dim)
    #   w12_ref: (in_pad + H, H)   rows [0:in_dim] = w1, rows [in_pad:] = w2
    #   w3_ref:  (H, H)            cols [out_dim:] are zero-padded
    #   b_ref:   (1, 3*H)          [b1 | b2 | b3 (zero-padded to H)]
    #   o_ref:   (1, tile_b, H)    lane-dense (128-wide) output slab
    in_dim = x_ref.shape[1]
    H = w3_ref.shape[0]
    in_pad = w12_ref.shape[0] - H

    x = x_ref[...]  # (tb, in_dim) f32

    # Layer 1: Linear + ReLU
    w1 = w12_ref[0:in_dim, :]               # (in_dim, H)
    b1 = b_ref[:, 0:H]                      # (1, H)
    h = jnp.dot(x, w1, preferred_element_type=jnp.float32,
                precision=jax.lax.Precision.HIGHEST) + b1
    h = jnp.maximum(h, 0.0)

    # Layer 2: Linear + ReLU
    w2 = w12_ref[in_pad:in_pad + H, :]      # (H, H)
    b2 = b_ref[:, H:2 * H]                  # (1, H)
    h = jnp.dot(h, w2, preferred_element_type=jnp.float32,
                precision=jax.lax.Precision.HIGHEST) + b2
    h = jnp.maximum(h, 0.0)

    # Layer 3: Linear (output axis kept at full padded width H for a
    # lane-dense, unmasked store; wrapper slices [..., :out_dim]).
    w3 = w3_ref[...]                        # (H, H)
    b3 = b_ref[:, 2 * H:3 * H]              # (1, H)
    out = jnp.dot(h, w3, preferred_element_type=jnp.float32,
                  precision=jax.lax.Precision.HIGHEST) + b3   # (tb, H)

    o_ref[...] = out[None].astype(o_ref.dtype)


def pack_params(w1, b1, w2, b2, w3, b3):
    """Pack 6 Linear params into 3 DMA-friendly buffers (done once, offline).

    w*: (fan_in, fan_out) == transpose of torch Linear.weight
    b*: (fan_out,)
    Returns (w12_packed, w3_packed, b_packed, out_dim).
    """
    in_dim, H = w1.shape
    out_dim = w3.shape[1]
    assert w2.shape == (H, H)

    in_pad = _round_up(in_dim, 8)
    w12 = jnp.zeros((in_pad + H, H), jnp.float32)
    w12 = w12.at[:in_dim, :].set(w1).at[in_pad:, :].set(w2)      # (in_pad+H, H)

    w3p = jnp.zeros((H, H), jnp.float32).at[:, :out_dim].set(w3)  # (H, H)

    b3p = jnp.zeros((H,), jnp.float32).at[:out_dim].set(b3.reshape(-1))
    b_packed = jnp.concatenate(
        [b1.reshape(-1), b2.reshape(-1), b3p]).reshape(1, 3 * H)  # (1, 3H)

    return w12, w3p, b_packed, out_dim


@functools.partial(jax.jit, static_argnames=("out_dim",))
def mlp_forward(state, w12_packed, w3_packed, b_packed, *, out_dim):
    """Fused Pallas forward of the MLP.

    state: (B, in_dim) float32
    returns: (1, B, out_dim)  — matches PyTorch's `.unsqueeze(0)`.
    """
    B, in_dim = state.shape
    H = w3_packed.shape[0]

    # Tile selection: one tile at tiny B; otherwise aim for >= 2 grid steps
    # (megacore sharding on v7x) with an 8-aligned tile, capped at 1024 rows.
    cap = 1024
    if B < 16:
        tile_b = B
    else:
        tile_b = min(cap, _round_up(pl.cdiv(B, 2), 8))
    grid = (pl.cdiv(B, tile_b),)

    flops = 2 * B * (in_dim * H + H * H + H * H)
    bytes_accessed = 4 * (state.size + w12_packed.size + w3_packed.size
                          + b_packed.size + B * H)

    out_padded = pl.pallas_call(
        _mlp_kernel,
        out_shape=jax.ShapeDtypeStruct((1, B, H), jnp.float32),
        grid=grid,
        in_specs=[
            pl.BlockSpec((tile_b, in_dim), lambda i: (i, 0)),
            # Constant index_maps -> weights/biases stay VMEM-resident.
            pl.BlockSpec(w12_packed.shape, lambda i: (0, 0)),
            pl.BlockSpec(w3_packed.shape, lambda i: (0, 0)),
            pl.BlockSpec(b_packed.shape, lambda i: (0, 0)),
        ],
        out_specs=pl.BlockSpec((1, tile_b, H), lambda i: (0, i, 0)),
        compiler_params=pltpu.CompilerParams(
            dimension_semantics=("parallel",)),
        cost_estimate=pl.CostEstimate(
            flops=flops, transcendentals=0, bytes_accessed=bytes_accessed),
    )(state, w12_packed, w3_packed, b_packed)

    # Cheap wrapper slice (B*out_dim floats) instead of a masked 8-lane store.
    return out_padded[..., :out_dim]


def init_params(key, input_dim, output_dim, hidden_dim=128):
    """Deterministic init mimicking PyTorch Linear default (U[-1/sqrt(fan_in), +])."""
    ks = jax.random.split(key, 6)

    def linear(kw, kb, fan_in, fan_out):
        bound = 1.0 / jnp.sqrt(fan_in)
        w = jax.random.uniform(kw, (fan_in, fan_out), jnp.float32, -bound, bound)
        b = jax.random.uniform(kb, (fan_out,), jnp.float32, -bound, bound)
        return w, b

    w1, b1 = linear(ks[0], ks[1], input_dim, hidden_dim)
    w2, b2 = linear(ks[2], ks[3], hidden_dim, hidden_dim)
    w3, b3 = linear(ks[4], ks[5], hidden_dim, output_dim)
    return (w1, b1, w2, b2, w3, b3)


def mlp_reference(state, params):
    w1, b1, w2, b2, w3, b3 = params
    h = jnp.maximum(state @ w1 + b1, 0.0)
    h = jnp.maximum(h @ w2 + b2, 0.0)
    return (h @ w3 + b3)[None, ...]


if __name__ == "__main__":
    key = jax.random.PRNGKey(0)
    k_param, k_state = jax.random.split(key)

    batch = 2
    input_dim = 16
    hidden_dim = 128
    output_dim = 8

    params = init_params(k_param, input_dim, output_dim, hidden_dim)
    w12_packed, w3_packed, b_packed, out_dim = pack_params(*params)

    state = jax.random.normal(k_state, (batch, input_dim), jnp.float32)
    cond = {"state": state}

    out = mlp_forward(cond["state"], w12_packed, w3_packed, b_packed,
                      out_dim=out_dim)
    out = jax.block_until_ready(out)

    ref = mlp_reference(cond["state"], params)
    assert out.shape == (1, batch, output_dim), out.shape
    assert jnp.allclose(out, ref, atol=1e-5, rtol=1e-5), "mismatch vs reference"

    print("KERNEL_OK")
</pallas_src>

<mosaic_0001>
module attributes {stable_mosaic.version = 11 : i64} {
  func.func @_mlp_kernel(%arg0: i32, %arg1: memref<2x16xf32, #tpu.memory_space<vmem>>, %arg2: memref<144x128xf32, #tpu.memory_space<vmem>>, %arg3: memref<128x128xf32, #tpu.memory_space<vmem>>, %arg4: memref<1x384xf32, #tpu.memory_space<vmem>>, %arg5: memref<1x2x128xf32, #tpu.memory_space<vmem>>) attributes {dimension_semantics = [#tpu.dimension_semantics<parallel>], iteration_bounds = array<i64: 1>, scalar_prefetch = 0 : i64, scratch_operands = 0 : i64, tpu.core_type = #tpu.core_type<tc>, window_params = [{transform_indices = @transform_0, window_bounds = array<i64: 2, 16>}, {pipeline_mode = #tpu.pipeline_mode<synchronous>, transform_indices = @transform_1, window_bounds = array<i64: 144, 128>}, {pipeline_mode = #tpu.pipeline_mode<synchronous>, transform_indices = @transform_2, window_bounds = array<i64: 128, 128>}, {pipeline_mode = #tpu.pipeline_mode<synchronous>, transform_indices = @transform_3, window_bounds = array<i64: 1, 384>}, {transform_indices = @transform_4, window_bounds = array<i64: 1, 2, 128>}]} {
    %c0 = arith.constant 0 : index
    %c0_0 = arith.constant 0 : index
    %0 = vector.load %arg1[%c0, %c0_0] : memref<2x16xf32, #tpu.memory_space<vmem>>, vector<2x16xf32>
    %c0_1 = arith.constant 0 : index
    %c0_2 = arith.constant 0 : index
    %1 = vector.load %arg2[%c0_1, %c0_2] : memref<144x128xf32, #tpu.memory_space<vmem>>, vector<16x128xf32>
    %c0_3 = arith.constant 0 : index
    %c0_4 = arith.constant 0 : index
    %2 = vector.load %arg4[%c0_3, %c0_4] : memref<1x384xf32, #tpu.memory_space<vmem>>, vector<1x128xf32>
    %cst = arith.constant dense<0.000000e+00> : vector<2x128xf32>
    %3 = tpu.matmul %0, %1, %cst {dimension_numbers = #tpu.dot_dimension_numbers<[1], [0], [0], [1], [0, 0, 1, 1], [], []>, precision = #tpu.contract_precision<fp32>} : vector<2x16xf32>, vector<16x128xf32>, vector<2x128xf32> -> vector<2x128xf32>
    %4 = vector.broadcast %2 : vector<1x128xf32> to vector<2x128xf32>
    %5 = arith.addf %3, %4 : vector<2x128xf32>
    %cst_5 = arith.constant 0.000000e+00 : f32
    %6 = vector.broadcast %cst_5 : f32 to vector<2x128xf32>
    %7 = arith.maximumf %5, %6 : vector<2x128xf32>
    %c16 = arith.constant 16 : index
    %c0_6 = arith.constant 0 : index
    %8 = vector.load %arg2[%c16, %c0_6] : memref<144x128xf32, #tpu.memory_space<vmem>>, vector<128x128xf32>
    %c0_7 = arith.constant 0 : index
    %c128 = arith.constant 128 : index
    %9 = vector.load %arg4[%c0_7, %c128] : memref<1x384xf32, #tpu.memory_space<vmem>>, vector<1x128xf32>
    %cst_8 = arith.constant dense<0.000000e+00> : vector<2x128xf32>
    %10 = tpu.matmul %7, %8, %cst_8 {dimension_numbers = #tpu.dot_dimension_numbers<[1], [0], [0], [1], [0, 0, 1, 1], [], []>, precision = #tpu.contract_precision<fp32>} : vector<2x128xf32>, vector<128x128xf32>, vector<2x128xf32> -> vector<2x128xf32>
    %11 = vector.broadcast %9 : vector<1x128xf32> to vector<2x128xf32>
    %12 = arith.addf %10, %11 : vector<2x128xf32>
    %cst_9 = arith.constant 0.000000e+00 : f32
    %13 = vector.broadcast %cst_9 : f32 to vector<2x128xf32>
    %14 = arith.maximumf %12, %13 : vector<2x128xf32>
    %c0_10 = arith.constant 0 : index
    %c0_11 = arith.constant 0 : index
    %15 = vector.load %arg3[%c0_10, %c0_11] : memref<128x128xf32, #tpu.memory_space<vmem>>, vector<128x128xf32>
    %c0_12 = arith.constant 0 : index
    %c256 = arith.constant 256 : index
    %16 = vector.load %arg4[%c0_12, %c256] : memref<1x384xf32, #tpu.memory_space<vmem>>, vector<1x128xf32>
    %cst_13 = arith.constant dense<0.000000e+00> : vector<2x128xf32>
    %17 = tpu.matmul %14, %15, %cst_13 {dimension_numbers = #tpu.dot_dimension_numbers<[1], [0], [0], [1], [0, 0, 1, 1], [], []>, precision = #tpu.contract_precision<fp32>} : vector<2x128xf32>, vector<128x128xf32>, vector<2x128xf32> -> vector<2x128xf32>
    %18 = vector.broadcast %16 : vector<1x128xf32> to vector<2x128xf32>
    %19 = arith.addf %17, %18 : vector<2x128xf32>
    %20 = vector.shape_cast %19 : vector<2x128xf32> to vector<1x2x128xf32>
    %c0_14 = arith.constant 0 : index
    %c0_15 = arith.constant 0 : index
    %c0_16 = arith.constant 0 : index
    %21 = vector.load %arg5[%c0_14, %c0_15, %c0_16] : memref<1x2x128xf32, #tpu.memory_space<vmem>>, vector<1x2x128xf32>
    tpu.vector_store %arg5[%c0_14, %c0_15, %c0_16], %20 {strides = array<i32>} : memref<1x2x128xf32, #tpu.memory_space<vmem>>, vector<1x2x128xf32>,
    return
  }
  func.func @transform_0(%arg0: i32) -> (i32, i32) {
    %c0_i32 = arith.constant 0 : i32
    %c0_i32_0 = arith.constant 0 : i32
    return %arg0, %c0_i32 : i32, i32
  }
  func.func @transform_1(%arg0: i32) -> (i32, i32) {
    %c0_i32 = arith.constant 0 : i32
    %c0_i32_0 = arith.constant 0 : i32
    %c0_i32_1 = arith.constant 0 : i32
    return %c0_i32, %c0_i32_0 : i32, i32
  }
  func.func @transform_2(%arg0: i32) -> (i32, i32) {
    %c0_i32 = arith.constant 0 : i32
    %c0_i32_0 = arith.constant 0 : i32
    %c0_i32_1 = arith.constant 0 : i32
    return %c0_i32, %c0_i32_0 : i32, i32
  }
  func.func @transform_3(%arg0: i32) -> (i32, i32) {
    %c0_i32 = arith.constant 0 : i32
    %c0_i32_0 = arith.constant 0 : i32
    %c0_i32_1 = arith.constant 0 : i32
    return %c0_i32, %c0_i32_0 : i32, i32
  }
  func.func @transform_4(%arg0: i32) -> (i32, i32, i32) {
    %c0_i32 = arith.constant 0 : i32
    %c0_i32_0 = arith.constant 0 : i32
    %c0_i32_1 = arith.constant 0 : i32
    return %c0_i32, %arg0, %c0_i32_0 : i32, i32, i32
  }
}

</mosaic_0001>

<bundles_post_ra>
// kernel: mlp_forward.1
= control target key start
LH: loop header
LB: loop body
LE: loop exit
PB: predicated region body
PF: predicated region fallthrough
CT: control target
= control target key end

     0   :  { %9 = vsyncpa [#allocation3], 0  ;;  %s3472_s0 = inlined_call_operand.hbm [shape: f32[2,16], index: 0, kind: input, shape index: {}]   ;;  %s3473_s1 = inlined_call_operand.hbm [shape: f32[144,128], index: 1, kind: input, shape index: {}]   ;;  %s3474_s2 = inlined_call_operand.hbm [shape: f32[128,128], index: 2, kind: input, shape index: {}]   ;;  %s3475_s3 = inlined_call_operand.vmem [shape: f32[1,384], index: 3, kind: input, shape index: {}]   ;;  %s3476_s4 = inlined_call_operand.hbm [shape: f32[1,2,128], index: 4, kind: output, shape index: {}]  }
   0x1   :  { %10 = vsyncpa [#allocation6], 0 }
   0x2   :  { %11 = vsyncpa [#allocation4], 0  ;;  %s2658_s15 = smov [#allocation5]  }
   0x3   :  { %s27_s16 = sshll.u32 %s2658_s15, 4  ;;  %s28_s16 = int_to_ptr.vmem [resolvable:$true] %s27_s16 }
   0x4   :  { %s2580_s17 = scalar_lea.vmem %s28_s16, 2304  ;;  %p2585_p1 = scmp.lt.s32.totalorder %s28_s16, %s28_s16 }
   0x5   :  { %p2581_p0 = scmp.ne.s32.totalorder %s28_s16, %s2580_s17  ;;  %p2586_p2 = scmp.lt.s32.totalorder %s2580_s17, %s2580_s17 }
   0x7   :  { %p2587_p3 = por %p2586_p2, %p2585_p1 }
   0x9   :  { %p2588_p4 = pnand %p2587_p3, %p2581_p0 }
   0xb   :  { %2591 = shalt.err (!%p2588_p4)
}
   0xc   :  { %s2659_s18 = smov 128   ;;  %s2660_s19 = smov 8  }
   0xd   :  { %33 = dma.hbm_to_vmem [thread:$0]  %s3473_s1, 2304, %s28_s16, [#allocation6], %s2659_s18, %s2659_s18, %s2660_s19  }
   0xe   :  { %s2661_s22 = smov [#allocation2]   ;;  %s2662_s24 = smov [#allocation7]  }
   0xf   :  { %s18_s23 = sshll.u32 %s2661_s22, 4  ;;  %s39_s25 = sshll.u32 %s2662_s24, 4  ;;  %s19_s23 = int_to_ptr.vmem [resolvable:$true] %s18_s23  ;;  %s40_s25 = int_to_ptr.vmem [resolvable:$true] %s39_s25 }
  0x10   :  { %s2600_s26 = scalar_lea.vmem %s19_s23, 32  ;;  %p2605_p6 = scmp.lt.s32.totalorder %s19_s23, %s19_s23 }
  0x11   :  { %p2601_p5 = scmp.ne.s32.totalorder %s19_s23, %s2600_s26  ;;  %p2606_p7 = scmp.lt.s32.totalorder %s2600_s26, %s2600_s26 }
  0x13   :  { %p2607_p8 = por %p2606_p7, %p2605_p6 }
  0x15   :  { %p2608_p9 = pnand %p2607_p8, %p2601_p5 }
  0x17   :  { %2611 = shalt.err (!%p2608_p9)
}
  0x18   :  { %21 = dma.hbm_to_vmem [thread:$0]  %s3472_s0, 32, %s19_s23, [#allocation3]  }
  0x19   :  { %s2620_s29 = scalar_lea.vmem %s40_s25, 2048  ;;  %p2625_p11 = scmp.lt.s32.totalorder %s40_s25, %s40_s25 }
  0x1a   :  { %p2621_p10 = scmp.ne.s32.totalorder %s40_s25, %s2620_s29  ;;  %p2626_p12 = scmp.lt.s32.totalorder %s2620_s29, %s2620_s29 }
  0x1c   :  { %p2627_p13 = por %p2626_p12, %p2625_p11 }
  0x1e   :  { %p2628_p0 = pnand %p2627_p13, %p2621_p10 }
  0x20   :  { %2631 = shalt.err (!%p2628_p0)
}
  0x21   :  { %45 = dma.hbm_to_vmem [thread:$0]  %s3474_s2, 2048, %s40_s25, [#allocation6], %s2659_s18, %s2659_s18, %s2660_s19  }
  0x22   :  { %2652 = dma.done.wait [#allocation3], 32  }
  0x23   :  { %2653 = vsyncadd [#allocation3], 4294967264 }
  0x24   :  { %2654 = dma.done.wait [#allocation6], 4352  }
  0x25   :  { %2655 = vsyncadd [#allocation6], 4294962944  ;;  %v2663_v0 = vmov 0.0   ;;  %vm2664_vm0 = vmmov 0   ;;  %vm67_vm1 = vcmask 130048   ;;  %v59_v1 = vld [vmem:[#allocation5 + $0x8] sm:$0xff] }
  0x26   :  { %2102 = vmatprep.subr.mxu0 %v2663_v0  ;;  %2109 = vmatprep.subr.mxu1 %v2663_v0  ;;  %v58_v2 = vld [vmem:[#allocation5] sm:$0xff]  ;;  %v57_v3 = vld [vmem:[#allocation2] sm:$0x3]  ;;  %v2706_v4 = vand.u32 4294901760, %v59_v1  ;;  %v546_v10 = vld [vmem:[#allocation5 + $0x88] sm:$0xff]  ;;  %s2665_s9 = smov [#allocation8]  }
  0x27   :  { %2106 = vmatprep.mubr.msk.f32.mxu0 %vm2664_vm0, %v2663_v0  ;;  %2113 = vmatprep.mubr.msk.f32.mxu1 %vm2664_vm0, %v2663_v0  ;;  %v2708_v5 = vand.u32 4294901760, %v58_v2  ;;  %v69_v6 = vsel %vm67_vm1, %v57_v3, 0  ;;  %v545_v14 = vld [vmem:[#allocation5 + $0x80] sm:$0xff]  ;;  %v2719_v16 = vand.u32 4294901760, %v546_v10  ;;  %v544_v19 = vld [vmem:[#allocation5 + $0x78] sm:$0xff]  ;;  %v543_v24 = vld [vmem:[#allocation5 + $0x70] sm:$0xff] }
  0x28   :  { %v2710_v7 = vand.u32 4294901760, %v69_v6  ;;  %2103 = vmatpush3.msra.mxu0 %v2706_v4  ;;  %v178_v8 = vsub.f32 %v59_v1, %v2706_v4  ;;  %v2721_v21 = vand.u32 4294901760, %v545_v14  ;;  %v2726_v27 = vand.u32 4294901760, %v544_v19  ;;  %v542_v28 = vld [vmem:[#allocation5 + $0x68] sm:$0xff]  ;;  %v541_v31 = vld [vmem:[#allocation5 + $0x60] sm:$0xff]  ;;  %v540_v35 = vld [vmem:[#allocation5 + $0x58] sm:$0xff] }
  0x29   :  { %v185_v9 = vsub.f32 %v58_v2, %v2708_v5  ;;  %2104 = vmatprep.subr.mxu0 %v2663_v0  ;;  %v2724_v26 = vsub.f32 %v546_v10, %v2719_v16  ;;  %v2732_v30 = vand.u32 4294901760, %v543_v24  ;;  %v2740_v34 = vand.u32 4294901760, %v542_v28  ;;  %v539_v39 = vld [vmem:[#allocation5 + $0x50] sm:$0xff]  ;;  %v536_v10 = vld [vmem:[#allocation5 + $0x38] sm:$0xff]  ;;  %s1867_s10 = sshll.u32 %s2665_s9, 4  ;;  %s1868_s10 = int_to_ptr.vmem [resolvable:$true] %s1867_s10 }
  0x2a   :  { %v139_v11 = vsub.f32 %v69_v6, %v2710_v7  ;;  %2105 = vmatpush3.msra.mxu0 %v2708_v5  ;;  %v179_v12 = vand.u32 4294901760, %v178_v8  ;;  %v2730_v29 = vsub.f32 %v545_v14, %v2721_v21  ;;  %v2738_v33 = vsub.f32 %v544_v19, %v2726_v27  ;;  %v535_v14 = vld [vmem:[#allocation5 + $0x30] sm:$0xff]  ;;  %s2632_s11 = scalar_lea.vmem %s1868_s10, 32  ;;  %p2637_p2 = scmp.lt.s32.totalorder %s1868_s10, %s1868_s10 }
  0x2b   :  { %v186_v13 = vand.u32 4294901760, %v185_v9  ;;  %2116 = vmatprep.subr.mxu0 %v2663_v0  ;;  %v648_v32 = vand.u32 4294901760, %v2724_v26  ;;  %v2748_v37 = vsub.f32 %v543_v24, %v2732_v30  ;;  %v2750_v38 = vand.u32 4294901760, %v541_v31  ;;  %p2633_p1 = scmp.ne.s32.totalorder %s1868_s10, %s2632_s11  ;;  %p2638_p3 = scmp.lt.s32.totalorder %s2632_s11, %s2632_s11 }
  0x2c   :  { %v140_v15 = vand.u32 4294901760, %v139_v11  ;;  %v180_v17 = vsub.f32 %v178_v8, %v179_v12  ;;  %v655_v36 = vand.u32 4294901760, %v2730_v29  ;;  %v662_v41 = vand.u32 4294901760, %v2738_v33 }
  0x2d   :  { %v187_v18 = vsub.f32 %v185_v9, %v186_v13  ;;  %v649_v40 = vsub.f32 %v2724_v26, %v648_v32  ;;  %v2760_v42 = vsub.f32 %v542_v28, %v2740_v34  ;;  %v2762_v43 = vand.u32 4294901760, %v540_v35  ;;  %p2639_p4 = por %p2638_p3, %p2637_p2 }
  0x2e   :  { %v141_v20 = vsub.f32 %v139_v11, %v140_v15  ;;  %v181_v22 = vand.u32 4294901760, %v180_v17  ;;  %v656_v44 = vsub.f32 %v2730_v29, %v655_v36  ;;  %v669_v45 = vand.u32 4294901760, %v2748_v37 }
  0x2f   :  { %v188_v23 = vand.u32 4294901760, %v187_v18  ;;  %v2772_v46 = vsub.f32 %v541_v31, %v2750_v38  ;;  %v2774_v47 = vand.u32 4294901760, %v539_v39  ;;  %v650_v48 = vand.u32 4294901760, %v649_v40  ;;  %v533_v31 = vld [vmem:[#allocation5 + $0x20] sm:$0xff]  ;;  %p2640_p5 = pnand %p2639_p4, %p2633_p1 }
  0x30   :  { %v142_v25 = vand.u32 4294901760, %v141_v20  ;;  %2110 = vmatpush3.msra.mxu1 %v181_v22  ;;  %v663_v49 = vsub.f32 %v2738_v33, %v662_v41  ;;  %v676_v50 = vand.u32 4294901760, %v2760_v42  ;;  %v2785_v51 = vsub.f32 %v540_v35, %v2762_v43  ;;  %v534_v20 = vld [vmem:[#allocation5 + $0x28] sm:$0xff] }
  0x31   :  { %2111 = vmatprep.subr.mxu1 %v2663_v0  ;;  %v657_v52 = vand.u32 4294901760, %v656_v44  ;;  %v670_v53 = vsub.f32 %v2748_v37, %v669_v45  ;;  %v683_v54 = vand.u32 4294901760, %v2772_v46  ;;  %v2797_v55 = vsub.f32 %v539_v39, %v2774_v47 }
  0x32   :  { %2107 = vmatmul.mubr.f32.vlgmr.msra.gmra.mxu0 %v142_v25  ;;  %2112 = vmatpush3.msra.mxu1 %v188_v23  ;;  %v664_v56 = vand.u32 4294901760, %v663_v49  ;;  %v677_v57 = vsub.f32 %v2760_v42, %v676_v50  ;;  %v690_v58 = vand.u32 4294901760, %v2785_v51  ;;  %v2868_v19 = vand.u32 4294901760, %v535_v14  ;;  %v532_v49 = vld [vmem:[#allocation5 + $0x18] sm:$0xff] }
  0x33   :  { %2117 = vmatpush3.msra.mxu0 %v178_v8  ;;  %2114 = vmatmul.mubr.f32.vlgmr.msra.gmra.mxu1 %v2710_v7  ;;  %v671_v59 = vand.u32 4294901760, %v670_v53  ;;  %v684_v60 = vsub.f32 %v2772_v46, %v683_v54  ;;  %v697_v61 = vand.u32 4294901760, %v2797_v55  ;;  %v2880_v28 = vand.u32 4294901760, %v534_v20 }
  0x34   :  { %2118 = vmatprep.subr.mxu0 %v2663_v0  ;;  %2123 = vmatprep.subr.mxu1 %v2663_v0  ;;  %v678_v62 = vand.u32 4294901760, %v677_v57  ;;  %v691_v63 = vsub.f32 %v2785_v51, %v690_v58  ;;  %v2877_v25 = vsub.f32 %v535_v14, %v2868_v19  ;;  %v2887_v44 = vand.u32 4294901760, %v533_v31 }
  0x35   :  { %2119 = vmatpush3.msra.mxu0 %v185_v9  ;;  %2120 = vmatprep.mubr.msk.f32.mxu0 %vm2664_vm0, %v2663_v0  ;;  %v685_v1 = vand.u32 4294901760, %v684_v60  ;;  %v698_v2 = vsub.f32 %v2797_v55, %v697_v61  ;;  %v2900_v57 = vand.u32 4294901760, %v532_v49  ;;  %v531_v60 = vld [vmem:[#allocation5 + $0x10] sm:$0xff] }
  0x36   :  { %2124 = vmatpush3.msra.mxu1 %v2706_v4  ;;  %2121 = vmatmul.mubr.f32.vlgmr.msra.gmra.mxu0 %v139_v11  ;;  %v692_v3 = vand.u32 4294901760, %v691_v63  ;;  %v3481_v40 = vand.u32 4294901760, %v2877_v25 }
  0x37   :  { %2125 = vmatprep.subr.mxu1 %v2663_v0  ;;  %2130 = vmatprep.subr.mxu0 %v2663_v0 }
  0x38   :  { %2126 = vmatpush3.msra.mxu1 %v2708_v5  ;;  %2127 = vmatprep.mubr.msk.f32.mxu1 %vm2664_vm0, %v2663_v0  ;;  %v726_v53 = vsub.f32 %v2877_v25, %v3481_v40 }
  0x39   :  { %2131 = vmatpush3.msra.mxu0 %v179_v12  ;;  %2128 = vmatmul.mubr.f32.vlgmr.msra.gmra.mxu1 %v140_v15 }
  0x3a   :  { %2132 = vmatprep.subr.mxu0 %v2663_v0  ;;  %2137 = vmatprep.subr.mxu1 %v2663_v0 }
  0x3b   :  { %2133 = vmatpush3.msra.mxu0 %v186_v13  ;;  %2134 = vmatprep.mubr.msk.f32.mxu0 %vm2664_vm0, %v2663_v0  ;;  %v2857_v13 = vand.u32 4294901760, %v536_v10 }
  0x3c   :  { %2138 = vmatpush3.msra.mxu1 %v2706_v4  ;;  %2135 = vmatmul.mubr.f32.vlgmr.msra.gmra.mxu0 %v2710_v7  ;;  %v699_v4 = vand.u32 4294901760, %v698_v2  ;;  %v2910_v2 = vand.u32 4294901760, %v531_v60 }
  0x3d   :  { %2139 = vmatprep.subr.mxu1 %v2663_v0  ;;  %2141 = vmatprep.mubr.msk.f32.mxu1 %vm2664_vm0, %v2663_v0  ;;  %v2866_v18 = vsub.f32 %v536_v10, %v2857_v13 }
  0x3e   :  { %2140 = vmatpush3.msra.mxu1 %v2708_v5  ;;  %2144 = vmatprep.subr.mxu0 %v2663_v0  ;;  %v538_v5 = vld [vmem:[#allocation5 + $0x48] sm:$0xff] }
  0x3f   :  { %2142 = vmatmul.mubr.f32.vlgmr.msra.gmra.mxu1 %v2710_v7  ;;  %2179 = vmatprep.subr.mxu1 %v2663_v0  ;;  %v2844_v6 = vand.u32 4294901760, %v538_v5  ;;  %v537_v7 = vld [vmem:[#allocation5 + $0x40] sm:$0xff]  ;;  %v3482_v24 = vand.u32 4294901760, %v2866_v18 }
  0x40   :  { %2180 = vmatpush3.msra.mxu1 %v650_v48  ;;  %2145 = vmatpush3.msra.mxu0 %v2719_v16  ;;  %v2849_v9 = vand.u32 4294901760, %v537_v7  ;;  %v2891_v48 = vsub.f32 %v534_v20, %v2880_v28 }
  0x41   :  { %2181 = vmatprep.subr.mxu1 %v2663_v0  ;;  %2146 = vmatprep.subr.mxu0 %v2663_v0  ;;  %v2847_v8 = vsub.f32 %v538_v5, %v2844_v6  ;;  %v719_v39 = vsub.f32 %v2866_v18, %v3482_v24 }
  0x42   :  { %2182 = vmatpush3.msra.mxu1 %v657_v52  ;;  %2147 = vmatpush3.msra.mxu0 %v2721_v21  ;;  %v2855_v12 = vsub.f32 %v537_v7, %v2849_v9  ;;  %v2923_v7 = vsub.f32 %v531_v60, %v2910_v2 }
  0x43   :  { %2183 = vmatprep.subr.mxu1 %v2663_v0  ;;  %2148 = vmatprep.subr.mxu0 %v2663_v0  ;;  %v704_v11 = vand.u32 4294901760, %v2847_v8  ;;  %v720_v52 = vand.u32 4294901760, %v719_v39 }
  0x44   :  { %2184 = vmatpush3.msra.mxu1 %v664_v56  ;;  %2149 = vmatpush3.msra.mxu0 %v2726_v27  ;;  %v711_v17 = vand.u32 4294901760, %v2855_v12  ;;  %v2898_v56 = vsub.f32 %v533_v31, %v2887_v44  ;;  %v3477_v20 = vand.u32 4294901760, %v2923_v7 }
  0x45   :  { %2185 = vmatprep.subr.mxu1 %v2663_v0  ;;  %2150 = vmatprep.subr.mxu0 %v2663_v0  ;;  %v705_v15 = vsub.f32 %v2847_v8, %v704_v11 }
  0x46   :  { %2186 = vmatpush3.msra.mxu1 %v671_v59  ;;  %2151 = vmatpush3.msra.mxu0 %v2732_v30  ;;  %v712_v23 = vsub.f32 %v2855_v12, %v711_v17  ;;  %v3480_v59 = vand.u32 4294901760, %v2891_v48  ;;  %v3479_v63 = vand.u32 4294901760, %v2898_v56 }
  0x47   :  { %2187 = vmatprep.subr.mxu1 %v2663_v0  ;;  %2152 = vmatprep.subr.mxu0 %v2663_v0  ;;  %v706_v22 = vand.u32 4294901760, %v705_v15 }
  0x48   :  { %2188 = vmatpush3.msra.mxu1 %v678_v62  ;;  %2153 = vmatpush3.msra.mxu0 %v2740_v34  ;;  %v713_v35 = vand.u32 4294901760, %v712_v23  ;;  %v727_v62 = vand.u32 4294901760, %v726_v53  ;;  %v754_v23 = vsub.f32 %v2923_v7, %v3477_v20 }
  0x49   :  { %2189 = vmatprep.subr.mxu1 %v2663_v0  ;;  %2154 = vmatprep.subr.mxu0 %v2663_v0 }
  0x4a   :  { %2190 = vmatpush3.msra.mxu1 %v685_v1  ;;  %2155 = vmatpush3.msra.mxu0 %v2750_v38  ;;  %v2908_v1 = vsub.f32 %v532_v49, %v2900_v57  ;;  %v755_v31 = vand.u32 4294901760, %v754_v23 }
  0x4b   :  { %2191 = vmatprep.subr.mxu1 %v2663_v0  ;;  %2156 = vmatprep.subr.mxu0 %v2663_v0 }
  0x4c   :  { %2192 = vmatpush3.msra.mxu1 %v692_v3  ;;  %2157 = vmatpush3.msra.mxu0 %v2762_v43  ;;  %v733_v3 = vsub.f32 %v2891_v48, %v3480_v59  ;;  %v3478_v5 = vand.u32 4294901760, %v2908_v1 }
  0x4d   :  { %2193 = vmatprep.subr.mxu1 %v2663_v0  ;;  %2158 = vmatprep.subr.mxu0 %v2663_v0 }
  0x4e   :  { %2194 = vmatpush3.msra.mxu1 %v699_v4  ;;  %2159 = vmatpush3.msra.mxu0 %v2774_v47  ;;  %v740_v4 = vsub.f32 %v2898_v56, %v3479_v63  ;;  %v734_v10 = vand.u32 4294901760, %v733_v3  ;;  %v747_v15 = vsub.f32 %v2908_v1, %v3478_v5 }
  0x4f   :  { %2195 = vmatprep.subr.mxu1 %v2663_v0  ;;  %2160 = vmatprep.subr.mxu0 %v2663_v0 }
  0x50   :  { %2211 = vmatprep.mubr.msk.f32.mxu1 %vm2664_vm0, %v2663_v0  ;;  %2176 = vmatprep.mubr.msk.f32.mxu0 %vm2664_vm0, %v2663_v0  ;;  %v741_v14 = vand.u32 4294901760, %v740_v4 }
  0x51   :  { %2161 = vmatpush3.msra.mxu0 %v2844_v6  ;;  %2196 = vmatpush3.msra.mxu1 %v706_v22  ;;  %v748_v22 = vand.u32 4294901760, %v747_v15 }
  0x52   :  { %2162 = vmatprep.subr.mxu0 %v2663_v0  ;;  %2197 = vmatprep.subr.mxu1 %v2663_v0 }
  0x53   :  { %2163 = vmatpush3.msra.mxu0 %v2849_v9  ;;  %2198 = vmatpush3.msra.mxu1 %v713_v35  ;;  %v1877_v35 = vld [vmem:[%s3475_s3] ss:$0 sm:$0xff] }
  0x54   :  { %2164 = vmatprep.subr.mxu0 %v2663_v0  ;;  %2199 = vmatprep.subr.mxu1 %v2663_v0 }
  0x55   :  { %2165 = vmatpush3.msra.mxu0 %v2857_v13  ;;  %2200 = vmatpush3.msra.mxu1 %v720_v52 }
  0x56   :  { %2166 = vmatprep.subr.mxu0 %v2663_v0  ;;  %2201 = vmatprep.subr.mxu1 %v2663_v0 }
  0x57   :  { %2167 = vmatpush3.msra.mxu0 %v2868_v19  ;;  %2202 = vmatpush3.msra.mxu1 %v727_v62 }
  0x58   :  { %2168 = vmatprep.subr.mxu0 %v2663_v0  ;;  %2203 = vmatprep.subr.mxu1 %v2663_v0 }
  0x59   :  { %2169 = vmatpush3.msra.mxu0 %v2880_v28  ;;  %2204 = vmatpush3.msra.mxu1 %v734_v10 }
  0x5a   :  { %2170 = vmatprep.subr.mxu0 %v2663_v0  ;;  %2205 = vmatprep.subr.mxu1 %v2663_v0 }
  0x5b   :  { %2171 = vmatpush3.msra.mxu0 %v2887_v44  ;;  %2206 = vmatpush3.msra.mxu1 %v741_v14 }
  0x5c   :  { %2172 = vmatprep.subr.mxu0 %v2663_v0  ;;  %2207 = vmatprep.subr.mxu1 %v2663_v0 }
  0x5d   :  { %2173 = vmatpush3.msra.mxu0 %v2900_v57  ;;  %2208 = vmatpush3.msra.mxu1 %v748_v22 }
  0x5e   :  { %2174 = vmatprep.subr.mxu0 %v2663_v0  ;;  %2209 = vmatprep.subr.mxu1 %v2663_v0 }
  0x5f   :  { %2175 = vmatpush3.msra.mxu0 %v2910_v2  ;;  %2210 = vmatpush3.msra.mxu1 %v755_v31 }
  0x60   :  { %2214 = vmatprep.subr.mxu0 %v2663_v0  ;;  %2249 = vmatprep.subr.mxu1 %v2663_v0 }
  0xf2   :  { %v144_v39 = vpop.f32.mrf.mxu0 }
  0xf3   :  { %v145_v49 = vadd.f32 %v1877_v35, %v144_v39  ;;  %v225_v53 = vpop.f32.mrf.mxu1 }
  0xf4   :  { %v2108_v52 = vpop.f32.mrf.mxu0 }
  0xf5   :  { %v226_v60 = vadd.f32 %v225_v53, %v145_v49  ;;  %v2115_v62 = vpop.f32.mrf.mxu1 }
  0xf6   :  { %v301_v3 = vpop.f32.mrf.mxu0  ;;  %v1203_v62 = vld [vmem:[#allocation7 + $0x38] sm:$0xff] }
  0xf7   :  { %v302_v4 = vadd.f32 %v301_v3, %v226_v60 }
  0xf8   :  { %v2122_v10 = vpop.f32.mrf.mxu0 }
  0xf9   :  { %v376_v14 = vpop.f32.mrf.mxu1  ;;  %v3199_v10 = vand.u32 4294901760, %v1203_v62 }
  0xfa   :  { %v377_v15 = vadd.f32 %v376_v14, %v302_v4  ;;  %v1202_v14 = vld [vmem:[#allocation7 + $0x30] sm:$0xff] }
  0xfb   :  { %v2129_v22 = vpop.f32.mrf.mxu1 }
  0xfc   :  { %v453_v23 = vpop.f32.mrf.mxu0  ;;  %v3205_v22 = vsub.f32 %v1203_v62, %v3199_v10 }
  0xfd   :  { %v454_v31 = vadd.f32 %v453_v23, %v377_v15  ;;  %v3207_v23 = vand.u32 4294901760, %v1202_v14 }
  0xfe   :  { %v2136_v20 = vpop.f32.mrf.mxu0 }
  0xff   :  { %v526_v5 = vpop.f32.mrf.mxu1 }
 0x100   :  { %v527_v63 = vadd.f32 %v526_v5, %v454_v31  ;;  %v1201_v31 = vld [vmem:[#allocation7 + $0x28] sm:$0xff] }
 0x101   :  { %v2143_v59 = vpop.f32.mrf.mxu1 }
 0x102   :  { %v530_v40 = vmax.f32 %v527_v63, 0.0 }
 0x104   :  { %v2943_v24 = vand.u32 4294901760, %v530_v40 }
 0x106   :  { %v2946_v35 = vsub.f32 %v530_v40, %v2943_v24  ;;  %2212 = vmatmul.mubr.f32.vlgmr.msra.gmra.mxu1 %v2943_v24 }
 0x107   :  { %2250 = vmatpush3.msra.mxu1 %v2719_v16  ;;  %2281 = vmatprep.mubr.msk.f32.mxu1 %vm2664_vm0, %v2663_v0 }
 0x108   :  { %v637_v39 = vand.u32 4294901760, %v2946_v35  ;;  %2251 = vmatprep.subr.mxu1 %v2663_v0 }
 0x109   :  { %2252 = vmatpush3.msra.mxu1 %v2721_v21 }
 0x10a   :  { %v638_v59 = vsub.f32 %v2946_v35, %v637_v39  ;;  %2253 = vmatprep.subr.mxu1 %v2663_v0 }
 0x10b   :  { %2254 = vmatpush3.msra.mxu1 %v2726_v27 }
 0x10c   :  { %2255 = vmatprep.subr.mxu1 %v2663_v0  ;;  %v639_v40 = vand.u32 4294901760, %v638_v59  ;;  %v3214_v59 = vsub.f32 %v1202_v14, %v3207_v23 }
 0x10d   :  { %2256 = vmatpush3.msra.mxu1 %v2732_v30 }
 0x10e   :  { %2257 = vmatprep.subr.mxu1 %v2663_v0  ;;  %2177 = vmatmul.mubr.f32.vlgmr.msra.gmra.mxu0 %v639_v40  ;;  %v3216_v40 = vand.u32 4294901760, %v1201_v31 }
 0x10f   :  { %2215 = vmatpush3.msra.mxu0 %v2724_v26  ;;  %2258 = vmatpush3.msra.mxu1 %v2740_v34  ;;  %v3489_v26 = vand.u32 4294901760, %v2891_v48 }
 0x110   :  { %2216 = vmatprep.subr.mxu0 %v2663_v0  ;;  %2259 = vmatprep.subr.mxu1 %v2663_v0 }
 0x111   :  { %2217 = vmatpush3.msra.mxu0 %v2730_v29  ;;  %2260 = vmatpush3.msra.mxu1 %v2750_v38  ;;  %v3491_v29 = vand.u32 4294901760, %v2908_v1 }
 0x112   :  { %2218 = vmatprep.subr.mxu0 %v2663_v0  ;;  %2261 = vmatprep.subr.mxu1 %v2663_v0 }
 0x113   :  { %2219 = vmatpush3.msra.mxu0 %v2738_v33  ;;  %2262 = vmatpush3.msra.mxu1 %v2762_v43 }
 0x114   :  { %2220 = vmatprep.subr.mxu0 %v2663_v0  ;;  %2263 = vmatprep.subr.mxu1 %v2663_v0 }
 0x115   :  { %2221 = vmatpush3.msra.mxu0 %v2748_v37  ;;  %2264 = vmatpush3.msra.mxu1 %v2774_v47 }
 0x116   :  { %2222 = vmatprep.subr.mxu0 %v2663_v0  ;;  %2265 = vmatprep.subr.mxu1 %v2663_v0 }
 0x117   :  { %2223 = vmatpush3.msra.mxu0 %v2760_v42  ;;  %2266 = vmatpush3.msra.mxu1 %v2844_v6  ;;  %v1207_v42 = vld [vmem:[#allocation7 + $0x58] sm:$0xff] }
 0x118   :  { %2224 = vmatprep.subr.mxu0 %v2663_v0  ;;  %2267 = vmatprep.subr.mxu1 %v2663_v0 }
 0x119   :  { %2225 = vmatpush3.msra.mxu0 %v2772_v46  ;;  %2268 = vmatpush3.msra.mxu1 %v2849_v9  ;;  %v3122_v46 = vand.u32 4294901760, %v1207_v42 }
 0x11a   :  { %2226 = vmatprep.subr.mxu0 %v2663_v0  ;;  %2269 = vmatprep.subr.mxu1 %v2663_v0 }
 0x11b   :  { %2227 = vmatpush3.msra.mxu0 %v2785_v51  ;;  %2270 = vmatpush3.msra.mxu1 %v2857_v13  ;;  %v1204_v51 = vld [vmem:[#allocation7 + $0x40] sm:$0xff] }
 0x11c   :  { %2228 = vmatprep.subr.mxu0 %v2663_v0  ;;  %2271 = vmatprep.subr.mxu1 %v2663_v0 }
 0x11d   :  { %2229 = vmatpush3.msra.mxu0 %v2797_v55  ;;  %2272 = vmatpush3.msra.mxu1 %v2868_v19 }
 0x11e   :  { %2230 = vmatprep.subr.mxu0 %v2663_v0  ;;  %2273 = vmatprep.subr.mxu1 %v2663_v0 }
 0x11f   :  { %2231 = vmatpush3.msra.mxu0 %v2847_v8  ;;  %2274 = vmatpush3.msra.mxu1 %v2880_v28 }
 0x120   :  { %2232 = vmatprep.subr.mxu0 %v2663_v0  ;;  %2275 = vmatprep.subr.mxu1 %v2663_v0 }
 0x121   :  { %2233 = vmatpush3.msra.mxu0 %v2855_v12  ;;  %2276 = vmatpush3.msra.mxu1 %v2887_v44 }
 0x122   :  { %2234 = vmatprep.subr.mxu0 %v2663_v0  ;;  %2277 = vmatprep.subr.mxu1 %v2663_v0 }
 0x123   :  { %2235 = vmatpush3.msra.mxu0 %v2866_v18  ;;  %2278 = vmatpush3.msra.mxu1 %v2900_v57 }
 0x124   :  { %2236 = vmatprep.subr.mxu0 %v2663_v0  ;;  %2279 = vmatprep.subr.mxu1 %v2663_v0 }
 0x125   :  { %2237 = vmatpush3.msra.mxu0 %v2877_v25  ;;  %2280 = vmatpush3.msra.mxu1 %v2910_v2 }
 0x126   :  { %2238 = vmatprep.subr.mxu0 %v2663_v0  ;;  %2282 = vmatmul.mubr.f32.vlgmr.msra.gmra.mxu1 %v637_v39  ;;  %v1369_v39 = vand.u32 4294901760, %v3205_v22 }
 0x127   :  { %2319 = vmatprep.subr.mxu1 %v2663_v0  ;;  %2239 = vmatpush3.msra.mxu0 %v2891_v48 }
 0x128   :  { %2320 = vmatpush3.msra.mxu1 %v2719_v16  ;;  %2240 = vmatprep.subr.mxu0 %v2663_v0  ;;  %v3487_v16 = vand.u32 4294901760, %v2866_v18 }
 0x129   :  { %2321 = vmatprep.subr.mxu1 %v2663_v0  ;;  %2241 = vmatpush3.msra.mxu0 %v2898_v56 }
 0x12a   :  { %2322 = vmatpush3.msra.mxu1 %v2721_v21  ;;  %2242 = vmatprep.subr.mxu0 %v2663_v0  ;;  %v3488_v21 = vand.u32 4294901760, %v2877_v25 }
 0x12b   :  { %2323 = vmatprep.subr.mxu1 %v2663_v0  ;;  %2243 = vmatpush3.msra.mxu0 %v2908_v1 }
 0x12c   :  { %2324 = vmatpush3.msra.mxu1 %v2726_v27  ;;  %2244 = vmatprep.subr.mxu0 %v2663_v0  ;;  %v3490_v27 = vand.u32 4294901760, %v2898_v56 }
 0x12d   :  { %2325 = vmatprep.subr.mxu1 %v2663_v0  ;;  %2245 = vmatpush3.msra.mxu0 %v2923_v7 }
 0x12e   :  { %2246 = vmatprep.mubr.msk.f32.mxu0 %vm2664_vm0, %v2663_v0  ;;  %2326 = vmatpush3.msra.mxu1 %v2732_v30  ;;  %v3492_v30 = vand.u32 4294901760, %v2923_v7 }
 0x12f   :  { %2247 = vmatmul.mubr.f32.vlgmr.msra.gmra.mxu0 %v2946_v35  ;;  %2284 = vmatprep.subr.mxu0 %v2663_v0 }
 0x130   :  { %2327 = vmatprep.subr.mxu1 %v2663_v0  ;;  %2285 = vmatpush3.msra.mxu0 %v648_v32  ;;  %v1211_v32 = vld [vmem:[#allocation7 + $0x78] sm:$0xff] }
 0x131   :  { %2328 = vmatpush3.msra.mxu1 %v2740_v34  ;;  %2286 = vmatprep.subr.mxu0 %v2663_v0  ;;  %v3110_v33 = vand.u32 4294901760, %v1211_v32  ;;  %v1210_v34 = vld [vmem:[#allocation7 + $0x70] sm:$0xff] }
 0x132   :  { %2329 = vmatprep.subr.mxu1 %v2663_v0  ;;  %2287 = vmatpush3.msra.mxu0 %v655_v36  ;;  %v3115_v37 = vand.u32 4294901760, %v1210_v34 }
 0x133   :  { %2330 = vmatpush3.msra.mxu1 %v2750_v38  ;;  %2288 = vmatprep.subr.mxu0 %v2663_v0  ;;  %v3113_v36 = vsub.f32 %v1211_v32, %v3110_v33  ;;  %v1209_v38 = vld [vmem:[#allocation7 + $0x68] sm:$0xff] }
 0x134   :  { %2331 = vmatprep.subr.mxu1 %v2663_v0  ;;  %2289 = vmatpush3.msra.mxu0 %v662_v41  ;;  %v1208_v41 = vld [vmem:[#allocation7 + $0x60] sm:$0xff]  ;;  %v3127_v55 = vsub.f32 %v1210_v34, %v3115_v37 }
 0x135   :  { %2332 = vmatpush3.msra.mxu1 %v2762_v43  ;;  %2290 = vmatprep.subr.mxu0 %v2663_v0  ;;  %v3118_v43 = vand.u32 4294901760, %v1209_v38 }
 0x136   :  { %2333 = vmatprep.subr.mxu1 %v2663_v0  ;;  %2291 = vmatpush3.msra.mxu0 %v669_v45  ;;  %v3120_v45 = vand.u32 4294901760, %v1208_v41 }
 0x137   :  { %2334 = vmatpush3.msra.mxu1 %v2774_v47  ;;  %2292 = vmatprep.subr.mxu0 %v2663_v0  ;;  %v1206_v47 = vld [vmem:[#allocation7 + $0x50] sm:$0xff] }
 0x138   :  { %2335 = vmatprep.subr.mxu1 %v2663_v0  ;;  %2293 = vmatpush3.msra.mxu0 %v676_v50  ;;  %v1205_v50 = vld [vmem:[#allocation7 + $0x48] sm:$0xff]  ;;  %v3138_v8 = vsub.f32 %v1208_v41, %v3120_v45 }
 0x139   :  { %2336 = vmatpush3.msra.mxu1 %v2844_v6  ;;  %2294 = vmatprep.subr.mxu0 %v2663_v0  ;;  %v3135_v6 = vsub.f32 %v1209_v38, %v3118_v43 }
 0x13a   :  { %2337 = vmatprep.subr.mxu1 %v2663_v0  ;;  %2295 = vmatpush3.msra.mxu0 %v683_v54  ;;  %v1313_v54 = vand.u32 4294901760, %v3113_v36 }
 0x13b   :  { %2338 = vmatpush3.msra.mxu1 %v2849_v9  ;;  %2296 = vmatprep.subr.mxu0 %v2663_v0  ;;  %v3141_v9 = vsub.f32 %v1207_v42, %v3122_v46 }
 0x13c   :  { %2339 = vmatprep.subr.mxu1 %v2663_v0  ;;  %2297 = vmatpush3.msra.mxu0 %v690_v58  ;;  %v3130_v58 = vand.u32 4294901760, %v1206_v47  ;;  %v1314_v12 = vsub.f32 %v3113_v36, %v1313_v54 }
 0x13d   :  { %2340 = vmatpush3.msra.mxu1 %v2857_v13  ;;  %2298 = vmatprep.subr.mxu0 %v2663_v0  ;;  %v1320_v13 = vand.u32 4294901760, %v3127_v55  ;;  %v1341_v25 = vand.u32 4294901760, %v3141_v9 }
 0x13e   :  { %2341 = vmatprep.subr.mxu1 %v2663_v0  ;;  %2299 = vmatpush3.msra.mxu0 %v697_v61  ;;  %v3132_v61 = vand.u32 4294901760, %v1205_v50 }
 0x13f   :  { %2342 = vmatpush3.msra.mxu1 %v2868_v19  ;;  %2300 = vmatprep.subr.mxu0 %v2663_v0  ;;  %v1327_v19 = vand.u32 4294901760, %v3135_v6 }
 0x140   :  { %2343 = vmatprep.subr.mxu1 %v2663_v0  ;;  %2301 = vmatpush3.msra.mxu0 %v704_v11  ;;  %v3144_v11 = vand.u32 4294901760, %v1204_v51  ;;  %v3155_v18 = vsub.f32 %v1205_v50, %v3132_v61 }
 0x141   :  { %2344 = vmatpush3.msra.mxu1 %v2880_v28  ;;  %2302 = vmatprep.subr.mxu0 %v2663_v0  ;;  %v1315_v28 = vand.u32 4294901760, %v1314_v12 }
 0x142   :  { %2345 = vmatprep.subr.mxu1 %v2663_v0  ;;  %2303 = vmatpush3.msra.mxu0 %v711_v17  ;;  %v3151_v17 = vsub.f32 %v1206_v47, %v3130_v58  ;;  %v3167_v56 = vsub.f32 %v1204_v51, %v3144_v11  ;;  %v1355_v5 = vand.u32 4294901760, %v3155_v18  ;;  %v1198_v47 = vld [vmem:[#allocation7 + $0x10] sm:$0xff] }
 0x143   :  { %2346 = vmatpush3.msra.mxu1 %v2887_v44  ;;  %2304 = vmatprep.subr.mxu0 %v2663_v0  ;;  %v1321_v44 = vsub.f32 %v3127_v55, %v1320_v13 }
 0x144   :  { %2347 = vmatprep.subr.mxu1 %v2663_v0  ;;  %2305 = vmatpush3.msra.mxu0 %v3487_v16  ;;  %v1348_v48 = vand.u32 4294901760, %v3151_v17  ;;  %v1362_v52 = vand.u32 4294901760, %v3167_v56  ;;  %v1356_v60 = vsub.f32 %v3155_v18, %v1355_v5  ;;  %v1200_v16 = vld [vmem:[#allocation7 + $0x20] sm:$0xff] }
 0x145   :  { %2348 = vmatpush3.msra.mxu1 %v2900_v57  ;;  %2306 = vmatprep.subr.mxu0 %v2663_v0  ;;  %v1328_v57 = vsub.f32 %v3135_v6, %v1327_v19  ;;  %v1322_v1 = vand.u32 4294901760, %v1321_v44 }
 0x146   :  { %2349 = vmatprep.subr.mxu1 %v2663_v0  ;;  %2307 = vmatpush3.msra.mxu0 %v3488_v21  ;;  %v1349_v49 = vsub.f32 %v3151_v17, %v1348_v48  ;;  %v1363_v4 = vsub.f32 %v3167_v56, %v1362_v52  ;;  %v1357_v15 = vand.u32 4294901760, %v1356_v60  ;;  %v1370_v21 = vsub.f32 %v3205_v22, %v1369_v39 }
 0x147   :  { %2350 = vmatpush3.msra.mxu1 %v2910_v2  ;;  %2351 = vmatprep.mubr.msk.f32.mxu1 %vm2664_vm0, %v2663_v0  ;;  %v1342_v2 = vsub.f32 %v3141_v9, %v1341_v25  ;;  %v1329_v7 = vand.u32 4294901760, %v1328_v57  ;;  %v1197_v57 = vld [vmem:[#allocation7 + $0x8] sm:$0xff] }
 0x148   :  { %2308 = vmatprep.subr.mxu0 %v2663_v0  ;;  %2352 = vmatmul.mubr.f32.vlgmr.msra.gmra.mxu1 %v2943_v24  ;;  %v1350_v3 = vand.u32 4294901760, %v1349_v49  ;;  %v1364_v35 = vand.u32 4294901760, %v1363_v4  ;;  %v1371_v32 = vand.u32 4294901760, %v1370_v21  ;;  %v1196_v49 = vld [vmem:[#allocation7] sm:$0xff] }
 0x149   :  { %2309 = vmatpush3.msra.mxu0 %v3489_v26  ;;  %2316 = vmatprep.mubr.msk.f32.mxu0 %vm2664_vm0, %v2663_v0  ;;  %v1343_v53 = vand.u32 4294901760, %v1342_v2  ;;  %v1376_v26 = vand.u32 4294901760, %v3214_v59 }
 0x14a   :  { %2310 = vmatprep.subr.mxu0 %v2663_v0  ;;  %2389 = vmatprep.subr.mxu1 %v2663_v0 }
 0x14b   :  { %2311 = vmatpush3.msra.mxu0 %v3490_v27  ;;  %2421 = vmatprep.mubr.msk.f32.mxu1 %vm2664_vm0, %v2663_v0  ;;  %v3226_v27 = vsub.f32 %v1201_v31, %v3216_v40  ;;  %v1377_v34 = vsub.f32 %v3214_v59, %v1376_v26 }
 0x14c   :  { %2312 = vmatprep.subr.mxu0 %v2663_v0  ;;  %2390 = vmatpush3.msra.mxu1 %v1315_v28  ;;  %v3249_v28 = vand.u32 4294901760, %v1198_v47 }
 0x14d   :  { %2313 = vmatpush3.msra.mxu0 %v3491_v29  ;;  %2391 = vmatprep.subr.mxu1 %v2663_v0  ;;  %v3228_v29 = vand.u32 4294901760, %v1200_v16  ;;  %v1383_v38 = vand.u32 4294901760, %v3226_v27  ;;  %v1378_v50 = vand.u32 4294901760, %v1377_v34 }
 0x14e   :  { %2314 = vmatprep.subr.mxu0 %v2663_v0  ;;  %2392 = vmatpush3.msra.mxu1 %v1322_v1  ;;  %v3260_v2 = vsub.f32 %v1198_v47, %v3249_v28 }
 0x14f   :  { %2315 = vmatpush3.msra.mxu0 %v3492_v30  ;;  %2393 = vmatprep.subr.mxu1 %v2663_v0  ;;  %v1199_v30 = vld [vmem:[#allocation7 + $0x18] sm:$0xff]  ;;  %v3238_v41 = vsub.f32 %v1200_v16, %v3228_v29  ;;  %v1384_v51 = vsub.f32 %v3226_v27, %v1383_v38 }
 0x150   :  { %2317 = vmatmul.mubr.f32.vlgmr.msra.gmra.mxu0 %v2943_v24  ;;  %2354 = vmatprep.subr.mxu0 %v2663_v0  ;;  %v1334_v24 = vand.u32 4294901760, %v3138_v8  ;;  %v3242_v42 = vand.u32 4294901760, %v1199_v30  ;;  %v3485_v60 = vand.u32 4294901760, %v3260_v2 }
 0x151   :  { %2386 = vmatprep.mubr.msk.f32.mxu0 %vm2664_vm0, %v2663_v0  ;;  %2355 = vmatpush3.msra.mxu0 %v3110_v33  ;;  %v1390_v12 = vand.u32 4294901760, %v3238_v41 }
 0x152   :  { %2356 = vmatprep.subr.mxu0 %v2663_v0  ;;  %v1335_v63 = vsub.f32 %v3138_v8, %v1334_v24  ;;  %2394 = vmatpush3.msra.mxu1 %v1329_v7  ;;  %v3253_v44 = vsub.f32 %v1199_v30, %v3242_v42  ;;  %v3262_v7 = vand.u32 4294901760, %v1197_v57  ;;  %v1405_v14 = vsub.f32 %v3260_v2, %v3485_v60 }
 0x153   :  { %2357 = vmatpush3.msra.mxu0 %v3115_v37  ;;  %2395 = vmatprep.subr.mxu1 %v2663_v0  ;;  %v1391_v1 = vsub.f32 %v3238_v41, %v1390_v12 }
 0x154   :  { %2358 = vmatprep.subr.mxu0 %v2663_v0  ;;  %v1336_v20 = vand.u32 4294901760, %v1335_v63  ;;  %v1385_v63 = vand.u32 4294901760, %v1384_v51  ;;  %v3270_v62 = vsub.f32 %v1197_v57, %v3262_v7  ;;  %v1406_v16 = vand.u32 4294901760, %v1405_v14  ;;  %v1878_v14 = vld [vmem:[%s3475_s3 + $0x1] ss:$0 sm:$0xff] }
 0x155   :  { %2359 = vmatpush3.msra.mxu0 %v3118_v43 }
 0x156   :  { %2360 = vmatprep.subr.mxu0 %v2663_v0  ;;  %2396 = vmatpush3.msra.mxu1 %v1336_v20  ;;  %v3486_v20 = vand.u32 4294901760, %v3253_v44 }
 0x157   :  { %2361 = vmatpush3.msra.mxu0 %v3120_v45  ;;  %2397 = vmatprep.subr.mxu1 %v2663_v0 }
 0x158   :  { %2362 = vmatprep.subr.mxu0 %v2663_v0  ;;  %2398 = vmatpush3.msra.mxu1 %v1343_v53  ;;  %v1392_v53 = vand.u32 4294901760, %v1391_v1  ;;  %v1398_v4 = vsub.f32 %v3253_v44, %v3486_v20 }
 0x159   :  { %2363 = vmatpush3.msra.mxu0 %v3122_v46  ;;  %2399 = vmatprep.subr.mxu1 %v2663_v0 }
 0x15a   :  { %2364 = vmatprep.subr.mxu0 %v2663_v0  ;;  %2400 = vmatpush3.msra.mxu1 %v1350_v3  ;;  %v3272_v3 = vand.u32 4294901760, %v1196_v49 }
 0x15b   :  { %2365 = vmatpush3.msra.mxu0 %v3130_v58  ;;  %2401 = vmatprep.subr.mxu1 %v2663_v0 }
 0x15c   :  { %2366 = vmatprep.subr.mxu0 %v2663_v0  ;;  %2402 = vmatpush3.msra.mxu1 %v1357_v15  ;;  %v3484_v15 = vand.u32 4294901760, %v3270_v62  ;;  %v3285_v31 = vsub.f32 %v1196_v49, %v3272_v3 }
 0x15d   :  { %2367 = vmatpush3.msra.mxu0 %v3132_v61  ;;  %2403 = vmatprep.subr.mxu1 %v2663_v0 }
 0x15e   :  { %2368 = vmatprep.subr.mxu0 %v2663_v0  ;;  %2404 = vmatpush3.msra.mxu1 %v1364_v35  ;;  %v1399_v35 = vand.u32 4294901760, %v1398_v4  ;;  %v1412_v21 = vsub.f32 %v3270_v62, %v3484_v15  ;;  %v3483_v30 = vand.u32 4294901760, %v3285_v31 }
 0x15f   :  { %2369 = vmatpush3.msra.mxu0 %v3144_v11  ;;  %2405 = vmatprep.subr.mxu1 %v2663_v0 }
 0x160   :  { %2370 = vmatprep.subr.mxu0 %v2663_v0  ;;  %2406 = vmatpush3.msra.mxu1 %v1371_v32  ;;  %v1413_v32 = vand.u32 4294901760, %v1412_v21  ;;  %v1419_v34 = vsub.f32 %v3285_v31, %v3483_v30 }
 0x161   :  { %2371 = vmatpush3.msra.mxu0 %v3199_v10  ;;  %2407 = vmatprep.subr.mxu1 %v2663_v0 }
 0x162   :  { %2372 = vmatprep.subr.mxu0 %v2663_v0  ;;  %2408 = vmatpush3.msra.mxu1 %v1378_v50  ;;  %v1420_v47 = vand.u32 4294901760, %v1419_v34 }
 0x163   :  { %2373 = vmatpush3.msra.mxu0 %v3207_v23  ;;  %2409 = vmatprep.subr.mxu1 %v2663_v0 }
 0x164   :  { %2374 = vmatprep.subr.mxu0 %v2663_v0  ;;  %2410 = vmatpush3.msra.mxu1 %v1385_v63 }
 0x165   :  { %2375 = vmatpush3.msra.mxu0 %v3216_v40  ;;  %2411 = vmatprep.subr.mxu1 %v2663_v0 }
 0x166   :  { %2376 = vmatprep.subr.mxu0 %v2663_v0  ;;  %2412 = vmatpush3.msra.mxu1 %v1392_v53 }
 0x167   :  { %2377 = vmatpush3.msra.mxu0 %v3228_v29  ;;  %2413 = vmatprep.subr.mxu1 %v2663_v0 }
 0x168   :  { %2378 = vmatprep.subr.mxu0 %v2663_v0  ;;  %2414 = vmatpush3.msra.mxu1 %v1399_v35 }
 0x169   :  { %2379 = vmatpush3.msra.mxu0 %v3242_v42  ;;  %2415 = vmatprep.subr.mxu1 %v2663_v0 }
 0x16a   :  { %2380 = vmatprep.subr.mxu0 %v2663_v0  ;;  %2416 = vmatpush3.msra.mxu1 %v1406_v16 }
 0x16b   :  { %2381 = vmatpush3.msra.mxu0 %v3249_v28  ;;  %2417 = vmatprep.subr.mxu1 %v2663_v0 }
 0x16c   :  { %2382 = vmatprep.subr.mxu0 %v2663_v0  ;;  %2418 = vmatpush3.msra.mxu1 %v1413_v32 }
 0x16d   :  { %2383 = vmatpush3.msra.mxu0 %v3262_v7  ;;  %2419 = vmatprep.subr.mxu1 %v2663_v0 }
 0x16e   :  { %2384 = vmatprep.subr.mxu0 %v2663_v0  ;;  %2420 = vmatpush3.msra.mxu1 %v1420_v47 }
 0x16f   :  { %2385 = vmatpush3.msra.mxu0 %v3272_v3  ;;  %2459 = vmatprep.subr.mxu1 %v2663_v0 }
 0x170   :  { %2424 = vmatprep.subr.mxu0 %v2663_v0 }
 0x1c6   :  { %v792_v50 = vpop.f32.mrf.mxu1 }
 0x1c8   :  { %v2213_v51 = vpop.f32.mrf.mxu1 }
 0x1ce   :  { %v641_v57 = vpop.f32.mrf.mxu0 }
 0x1cf   :  { %v642_v35 = vadd.f32 %v1878_v14, %v641_v57 }
 0x1d0   :  { %v2178_v63 = vpop.f32.mrf.mxu0 }
 0x1d1   :  { %v793_v21 = vadd.f32 %v792_v50, %v642_v35 }
 0x1e6   :  { %v985_v1 = vpop.f32.mrf.mxu1 }
 0x1e8   :  { %v2283_v49 = vpop.f32.mrf.mxu1 }
 0x1ef   :  { %v896_v53 = vpop.f32.mrf.mxu0 }
 0x1f0   :  { %v897_v34 = vadd.f32 %v896_v53, %v793_v21 }
 0x1f1   :  { %v2248_v4 = vpop.f32.mrf.mxu0 }
 0x1f2   :  { %v986_v47 = vadd.f32 %v985_v1, %v897_v34 }
 0x208   :  { %v1191_v16 = vpop.f32.mrf.mxu1 }
 0x20a   :  { %v2353_v32 = vpop.f32.mrf.mxu1 }
 0x210   :  { %v1104_v30 = vpop.f32.mrf.mxu0 }
 0x211   :  { %v1105_v15 = vadd.f32 %v1104_v30, %v986_v47 }
 0x212   :  { %v2318_v60 = vpop.f32.mrf.mxu0 }
 0x213   :  { %v1192_v51 = vadd.f32 %v1191_v16, %v1105_v15 }
 0x215   :  { %v1195_v20 = vmax.f32 %v1192_v51, 0.0 }
 0x217   :  { %v3305_v63 = vand.u32 4294901760, %v1195_v20 }
 0x219   :  { %v3308_v49 = vsub.f32 %v1195_v20, %v3305_v63  ;;  %2422 = vmatmul.mubr.f32.vlgmr.msra.gmra.mxu1 %v3305_v63 }
 0x21a   :  { %2460 = vmatpush3.msra.mxu1 %v3110_v33  ;;  %2491 = vmatprep.mubr.msk.f32.mxu1 %vm2664_vm0, %v2663_v0 }
 0x21b   :  { %v1302_v50 = vand.u32 4294901760, %v3308_v49  ;;  %2461 = vmatprep.subr.mxu1 %v2663_v0 }
 0x21c   :  { %2462 = vmatpush3.msra.mxu1 %v3115_v37 }
 0x21d   :  { %2463 = vmatprep.subr.mxu1 %v2663_v0  ;;  %v1303_v60 = vsub.f32 %v3308_v49, %v1302_v50 }
 0x21e   :  { %2464 = vmatpush3.msra.mxu1 %v3118_v43 }
 0x21f   :  { %2465 = vmatprep.subr.mxu1 %v2663_v0  ;;  %v1304_v20 = vand.u32 4294901760, %v1303_v60 }
 0x220   :  { %2466 = vmatpush3.msra.mxu1 %v3120_v45 }
 0x221   :  { %2467 = vmatprep.subr.mxu1 %v2663_v0  ;;  %2387 = vmatmul.mubr.f32.vlgmr.msra.gmra.mxu0 %v1304_v20 }
 0x222   :  { %2425 = vmatpush3.msra.mxu0 %v3113_v36  ;;  %2468 = vmatpush3.msra.mxu1 %v3122_v46  ;;  %v3494_v36 = vand.u32 4294901760, %v3260_v2 }
 0x223   :  { %2426 = vmatprep.subr.mxu0 %v2663_v0  ;;  %2469 = vmatprep.subr.mxu1 %v2663_v0 }
 0x224   :  { %2427 = vmatpush3.msra.mxu0 %v3127_v55  ;;  %2470 = vmatpush3.msra.mxu1 %v3130_v58 }
 0x225   :  { %2428 = vmatprep.subr.mxu0 %v2663_v0  ;;  %2471 = vmatprep.subr.mxu1 %v2663_v0 }
 0x226   :  { %2429 = vmatpush3.msra.mxu0 %v3135_v6  ;;  %2472 = vmatpush3.msra.mxu1 %v3132_v61 }
 0x227   :  { %2430 = vmatprep.subr.mxu0 %v2663_v0  ;;  %2473 = vmatprep.subr.mxu1 %v2663_v0 }
 0x228   :  { %2431 = vmatpush3.msra.mxu0 %v3138_v8  ;;  %2474 = vmatpush3.msra.mxu1 %v3144_v11 }
 0x229   :  { %2432 = vmatprep.subr.mxu0 %v2663_v0  ;;  %2475 = vmatprep.subr.mxu1 %v2663_v0 }
 0x22a   :  { %2433 = vmatpush3.msra.mxu0 %v3141_v9  ;;  %2476 = vmatpush3.msra.mxu1 %v3199_v10  ;;  %v1879_v9 = vld [vmem:[%s3475_s3 + $0x2] ss:$0 sm:$0xff] }
 0x22b   :  { %2434 = vmatprep.subr.mxu0 %v2663_v0  ;;  %2477 = vmatprep.subr.mxu1 %v2663_v0 }
 0x22c   :  { %2435 = vmatpush3.msra.mxu0 %v3151_v17  ;;  %2478 = vmatpush3.msra.mxu1 %v3207_v23 }
 0x22d   :  { %2436 = vmatprep.subr.mxu0 %v2663_v0  ;;  %2479 = vmatprep.subr.mxu1 %v2663_v0 }
 0x22e   :  { %2437 = vmatpush3.msra.mxu0 %v3155_v18  ;;  %2480 = vmatpush3.msra.mxu1 %v3216_v40 }
 0x22f   :  { %2438 = vmatprep.subr.mxu0 %v2663_v0  ;;  %2481 = vmatprep.subr.mxu1 %v2663_v0 }
 0x230   :  { %2439 = vmatpush3.msra.mxu0 %v3167_v56  ;;  %2482 = vmatpush3.msra.mxu1 %v3228_v29 }
 0x231   :  { %2440 = vmatprep.subr.mxu0 %v2663_v0  ;;  %2483 = vmatprep.subr.mxu1 %v2663_v0 }
 0x232   :  { %2441 = vmatpush3.msra.mxu0 %v3205_v22  ;;  %2484 = vmatpush3.msra.mxu1 %v3242_v42 }
 0x233   :  { %2442 = vmatprep.subr.mxu0 %v2663_v0  ;;  %2485 = vmatprep.subr.mxu1 %v2663_v0 }
 0x234   :  { %2443 = vmatpush3.msra.mxu0 %v3214_v59  ;;  %2486 = vmatpush3.msra.mxu1 %v3249_v28 }
 0x235   :  { %2444 = vmatprep.subr.mxu0 %v2663_v0  ;;  %2487 = vmatprep.subr.mxu1 %v2663_v0 }
 0x236   :  { %2445 = vmatpush3.msra.mxu0 %v3226_v27  ;;  %2488 = vmatpush3.msra.mxu1 %v3262_v7 }
 0x237   :  { %2446 = vmatprep.subr.mxu0 %v2663_v0  ;;  %2489 = vmatprep.subr.mxu1 %v2663_v0 }
 0x238   :  { %2447 = vmatpush3.msra.mxu0 %v3238_v41  ;;  %2490 = vmatpush3.msra.mxu1 %v3272_v3 }
 0x239   :  { %2448 = vmatprep.subr.mxu0 %v2663_v0  ;;  %2492 = vmatmul.mubr.f32.vlgmr.msra.gmra.mxu1 %v1302_v50 }
 0x23a   :  { %2529 = vmatprep.subr.mxu1 %v2663_v0  ;;  %2449 = vmatpush3.msra.mxu0 %v3253_v44 }
 0x23b   :  { %2530 = vmatpush3.msra.mxu1 %v3110_v33  ;;  %2450 = vmatprep.subr.mxu0 %v2663_v0  ;;  %v3493_v33 = vand.u32 4294901760, %v3253_v44 }
 0x23c   :  { %2531 = vmatprep.subr.mxu1 %v2663_v0  ;;  %2451 = vmatpush3.msra.mxu0 %v3260_v2 }
 0x23d   :  { %2532 = vmatpush3.msra.mxu1 %v3115_v37  ;;  %2452 = vmatprep.subr.mxu0 %v2663_v0  ;;  %v3495_v37 = vand.u32 4294901760, %v3270_v62 }
 0x23e   :  { %2533 = vmatprep.subr.mxu1 %v2663_v0  ;;  %2453 = vmatpush3.msra.mxu0 %v3270_v62 }
 0x23f   :  { %2534 = vmatpush3.msra.mxu1 %v3118_v43  ;;  %2454 = vmatprep.subr.mxu0 %v2663_v0  ;;  %v3496_v43 = vand.u32 4294901760, %v3285_v31 }
 0x240   :  { %2535 = vmatprep.subr.mxu1 %v2663_v0  ;;  %2455 = vmatpush3.msra.mxu0 %v3285_v31 }
 0x241   :  { %2456 = vmatprep.mubr.msk.f32.mxu0 %vm2664_vm0, %v2663_v0  ;;  %2536 = vmatpush3.msra.mxu1 %v3120_v45 }
 0x242   :  { %2457 = vmatmul.mubr.f32.vlgmr.msra.gmra.mxu0 %v3308_v49  ;;  %2494 = vmatprep.subr.mxu0 %v2663_v0 }
 0x243   :  { %2537 = vmatprep.subr.mxu1 %v2663_v0  ;;  %2495 = vmatpush3.msra.mxu0 %v1313_v54 }
 0x244   :  { %2538 = vmatpush3.msra.mxu1 %v3122_v46  ;;  %2496 = vmatprep.subr.mxu0 %v2663_v0 }
 0x245   :  { %2539 = vmatprep.subr.mxu1 %v2663_v0  ;;  %2497 = vmatpush3.msra.mxu0 %v1320_v13 }
 0x246   :  { %2540 = vmatpush3.msra.mxu1 %v3130_v58  ;;  %2498 = vmatprep.subr.mxu0 %v2663_v0 }
 0x247   :  { %2541 = vmatprep.subr.mxu1 %v2663_v0  ;;  %2499 = vmatpush3.msra.mxu0 %v1327_v19 }
 0x248   :  { %2542 = vmatpush3.msra.mxu1 %v3132_v61  ;;  %2500 = vmatprep.subr.mxu0 %v2663_v0 }
 0x249   :  { %2543 = vmatprep.subr.mxu1 %v2663_v0  ;;  %2501 = vmatpush3.msra.mxu0 %v1334_v24 }
 0x24a   :  { %2544 = vmatpush3.msra.mxu1 %v3144_v11  ;;  %2502 = vmatprep.subr.mxu0 %v2663_v0 }
 0x24b   :  { %2545 = vmatprep.subr.mxu1 %v2663_v0  ;;  %2503 = vmatpush3.msra.mxu0 %v1341_v25 }
 0x24c   :  { %2546 = vmatpush3.msra.mxu1 %v3199_v10  ;;  %2504 = vmatprep.subr.mxu0 %v2663_v0 }
 0x24d   :  { %2547 = vmatprep.subr.mxu1 %v2663_v0  ;;  %2505 = vmatpush3.msra.mxu0 %v1348_v48 }
 0x24e   :  { %2548 = vmatpush3.msra.mxu1 %v3207_v23  ;;  %2506 = vmatprep.subr.mxu0 %v2663_v0 }
 0x24f   :  { %2549 = vmatprep.subr.mxu1 %v2663_v0  ;;  %2507 = vmatpush3.msra.mxu0 %v1355_v5 }
 0x250   :  { %2550 = vmatpush3.msra.mxu1 %v3216_v40  ;;  %2508 = vmatprep.subr.mxu0 %v2663_v0 }
 0x251   :  { %2551 = vmatprep.subr.mxu1 %v2663_v0  ;;  %2509 = vmatpush3.msra.mxu0 %v1362_v52 }
 0x252   :  { %2552 = vmatpush3.msra.mxu1 %v3228_v29  ;;  %2510 = vmatprep.subr.mxu0 %v2663_v0 }
 0x253   :  { %2553 = vmatprep.subr.mxu1 %v2663_v0  ;;  %2511 = vmatpush3.msra.mxu0 %v1369_v39 }
 0x254   :  { %2554 = vmatpush3.msra.mxu1 %v3242_v42  ;;  %2512 = vmatprep.subr.mxu0 %v2663_v0 }
 0x255   :  { %2555 = vmatprep.subr.mxu1 %v2663_v0  ;;  %2513 = vmatpush3.msra.mxu0 %v1376_v26 }
 0x256   :  { %2556 = vmatpush3.msra.mxu1 %v3249_v28  ;;  %2514 = vmatprep.subr.mxu0 %v2663_v0 }
 0x257   :  { %2557 = vmatprep.subr.mxu1 %v2663_v0  ;;  %2515 = vmatpush3.msra.mxu0 %v1383_v38 }
 0x258   :  { %2558 = vmatpush3.msra.mxu1 %v3262_v7  ;;  %2516 = vmatprep.subr.mxu0 %v2663_v0 }
 0x259   :  { %2559 = vmatprep.subr.mxu1 %v2663_v0  ;;  %2517 = vmatpush3.msra.mxu0 %v1390_v12 }
 0x25a   :  { %2560 = vmatpush3.msra.mxu1 %v3272_v3  ;;  %2561 = vmatprep.mubr.msk.f32.mxu1 %vm2664_vm0, %v2663_v0 }
 0x25b   :  { %2518 = vmatprep.subr.mxu0 %v2663_v0  ;;  %2562 = vmatmul.mubr.f32.vlgmr.msra.gmra.mxu1 %v3305_v63 }
 0x25c   :  { %2519 = vmatpush3.msra.mxu0 %v3493_v33  ;;  %2526 = vmatprep.mubr.msk.f32.mxu0 %vm2664_vm0, %v2663_v0 }
 0x25d   :  { %2520 = vmatprep.subr.mxu0 %v2663_v0 }
 0x25e   :  { %2521 = vmatpush3.msra.mxu0 %v3494_v36 }
 0x25f   :  { %2522 = vmatprep.subr.mxu0 %v2663_v0 }
 0x260   :  { %2523 = vmatpush3.msra.mxu0 %v3495_v37 }
 0x261   :  { %2524 = vmatprep.subr.mxu0 %v2663_v0 }
 0x262   :  { %2525 = vmatpush3.msra.mxu0 %v3496_v43 }
 0x263   :  { %2527 = vmatmul.mubr.f32.vlgmr.msra.gmra.mxu0 %v3305_v63 }
 0x2d9   :  { %v1457_v45 = vpop.f32.mrf.mxu1 }
 0x2db   :  { %v2423_v46 = vpop.f32.mrf.mxu1 }
 0x2e1   :  { %v1306_v54 = vpop.f32.mrf.mxu0 }
 0x2e2   :  { %v1307_v11 = vadd.f32 %v1879_v9, %v1306_v54 }
 0x2e3   :  { %v2388_v55 = vpop.f32.mrf.mxu0 }
 0x2e4   :  { %v1458_v0 = vadd.f32 %v1457_v45, %v1307_v11 }
 0x2f9   :  { %v1650_v58 = vpop.f32.mrf.mxu1 }
 0x2fb   :  { %v2493_v61 = vpop.f32.mrf.mxu1 }
 0x302   :  { %v1561_v6 = vpop.f32.mrf.mxu0 }
 0x303   :  { %v1562_v18 = vadd.f32 %v1561_v6, %v1458_v0 }
 0x304   :  { %v2458_v8 = vpop.f32.mrf.mxu0 }
 0x305   :  { %v1651_v19 = vadd.f32 %v1650_v58, %v1562_v18 }
 0x31b   :  { %v1856_v13 = vpop.f32.mrf.mxu1 }
 0x31d   :  { %v2563_v17 = vpop.f32.mrf.mxu1 }
 0x323   :  { %v1769_v24 = vpop.f32.mrf.mxu0 }
 0x324   :  { %v1770_v25 = vadd.f32 %v1769_v24, %v1651_v19 }
 0x325   :  { %v2528_v48 = vpop.f32.mrf.mxu0 }
 0x326   :  { %v1857_v56 = vadd.f32 %v1856_v13, %v1770_v25 }
 0x328   :  { %1860 = vst [vmem:[#allocation8] sm:$0x3] %v1857_v56 }
 0x329   :  { %2643 = shalt.err (!%p2640_p5)
}
 0x32a   :  { %1870 = dma.vmem_to_hbm [thread:$0]  %s1868_s10, 32, %s3476_s4, [#allocation4]  }
 0x32b   :  { %2656 = dma.done.wait [#allocation4], 32  }
 0x32c   :  { %2657 = vsyncadd [#allocation4], 4294967264 }
 0x32d   :  { %1874 = vsyncpa [#allocation3], 1 }
 0x32e   :  { %1875 = vsyncpa [#allocation6], 1 }
 0x32f   :  { %1876 = vsyncpa [#allocation4], 1 }

</bundles_post_ra>
